<compile_context>
chip_gen: v7x
topology: tpu7x:2x2x1
jax: 0.10.0
libtpu: 0.0.40
codegen_flags: <defaults>
</compile_context>

<pallas_src>
import jax
import jax.numpy as jnp
from jax.experimental import pallas as pl
from jax.experimental.pallas import tpu as pltpu


def actor_critic_kernel(x_ref,
                        w1_ref, b1_ref,
                        w2_ref, b2_ref,
                        wh_ref, bh_ref,
                        out_ref):
    # Feature-major layout: x is (state_dim, TILE_B); batch on the lane axis.
    x = x_ref[...]

    # Layer 1 (state_dim -> 64): MXU dot.  K=4 padding is irrelevant since the
    # MXU has huge slack here; keeps VALU/XLU (the contended slots) free.
    h1 = jnp.tanh(jnp.dot(w1_ref[...], x,
                          preferred_element_type=jnp.float32) + b1_ref[...])

    # Layer 2 (64 -> 32): MXU dot.
    h2 = jnp.tanh(jnp.dot(w2_ref[...], h1,
                          preferred_element_type=jnp.float32) + b2_ref[...])

    # Fused actor+critic head: wh = [wa ; wc] (A+1, 32) -> head (A+1, TILE_B).
    head = jnp.dot(wh_ref[...], h2,
                   preferred_element_type=jnp.float32) + bh_ref[...]
    action_dim = head.shape[0] - 1

    logits = head[:action_dim, :]          # (A, TILE_B)
    value = head[action_dim:, :]           # (1, TILE_B)

    # Max-stabilized softmax across the (sublane) action axis; exact division
    # so probabilities sum to 1 to float32 precision.
    m = jnp.max(logits, axis=0, keepdims=True)
    e = jnp.exp(logits - m)
    denom = jnp.sum(e, axis=0, keepdims=True)
    probs = e / denom

    # Full-lane-width stores; rows land directly in the output slab.
    out_ref[:action_dim, :] = probs
    out_ref[action_dim:, :] = value


def _round_up(x, m):
    return ((x + m - 1) // m) * m


def _choose_tile_b(batch):
    # Grid-step overhead (~0.35 us) dominates at small tiles, so go big.
    # 1024 keeps per-tile VMEM use (~0.5 MiB incl. intermediates) far below
    # even v5e's 16 MiB scoped default.  For batches big enough to split,
    # cap the tile so num_tiles >= 2 (feeds v7x's two TensorCores via the
    # "parallel" batch axis); keep multiples of 128 for lane alignment.
    if batch < 256:
        return _round_up(max(batch, 1), 128)      # single lane-aligned tile
    return min(1024, _round_up(pl.cdiv(batch, 2), 128))


def actor_critic_forward(state, params):
    """state: (B, state_dim) float32.

    params: weights stored (out_features, in_features), biases (out_features, 1).
    Returns (action_probs (B, action_dim), value (B, 1)) matching the PyTorch
    ActorCritic.forward().
    """
    B, state_dim = state.shape
    action_dim = params["wa"].shape[0]
    head_dim = action_dim + 1

    # Fuse actor + critic linears into one head (tiny, constant under jit).
    wh = jnp.concatenate([params["wa"], params["wc"]], axis=0)   # (A+1, 32)
    bh = jnp.concatenate([params["ba"], params["bc"]], axis=0)   # (A+1, 1)

    tile_b = _choose_tile_b(B)
    num_tiles = pl.cdiv(B, tile_b)
    padded_B = num_tiles * tile_b

    # Feature-major: (state_dim, B) so the batch rides the 128-lane axis.
    xt = state.T
    if padded_B != B:
        xt = jnp.pad(xt, ((0, 0), (0, padded_B - B)))

    def resident(shape):
        # Constant index_map -> block never changes -> weights stay
        # VMEM-resident across the whole grid (total < 20 KB).
        return pl.BlockSpec(shape, lambda i: (0, 0))

    grid_spec = pltpu.PrefetchScalarGridSpec(
        num_scalar_prefetch=0,
        grid=(num_tiles,),
        in_specs=[
            pl.BlockSpec((state_dim, tile_b), lambda i: (0, i)),   # batch tile
            resident(params["w1"].shape), resident(params["b1"].shape),
            resident(params["w2"].shape), resident(params["b2"].shape),
            resident(wh.shape), resident(bh.shape),
        ],
        out_specs=pl.BlockSpec((head_dim, tile_b), lambda i: (0, i)),
    )

    out = pl.pallas_call(
        actor_critic_kernel,
        out_shape=jax.ShapeDtypeStruct((head_dim, padded_B), jnp.float32),
        grid_spec=grid_spec,
        compiler_params=pltpu.CompilerParams(
            dimension_semantics=("parallel",)),   # v7x: split tiles over 2 TCs
    )(xt,
      params["w1"], params["b1"],
      params["w2"], params["b2"],
      wh, bh)

    out = out[:, :B]
    probs = out[:action_dim, :].T    # (B, action_dim)
    value = out[action_dim:, :].T    # (B, 1)
    return probs, value


def actor_critic_reference(state, params):
    """Pure-JAX reference matching the PyTorch module."""
    h1 = jnp.tanh(state @ params["w1"].T + params["b1"].T)
    h2 = jnp.tanh(h1 @ params["w2"].T + params["b2"].T)
    logits = h2 @ params["wa"].T + params["ba"].T
    probs = jax.nn.softmax(logits, axis=-1)
    value = h2 @ params["wc"].T + params["bc"].T
    return probs, value


def init_params(key, state_dim, action_dim):
    """Deterministic synthetic init. Weights (out, in); biases (out, 1)."""
    ks = jax.random.split(key, 8)

    def lin(kw, kb, fan_in, fan_out):
        # PyTorch nn.Linear default: U(-1/sqrt(fan_in), 1/sqrt(fan_in))
        bound = 1.0 / jnp.sqrt(jnp.float32(fan_in))
        w = jax.random.uniform(kw, (fan_out, fan_in), jnp.float32, -bound, bound)
        b = jax.random.uniform(kb, (fan_out, 1), jnp.float32, -bound, bound)
        return w, b

    w1, b1 = lin(ks[0], ks[1], state_dim, 64)
    w2, b2 = lin(ks[2], ks[3], 64, 32)
    wa, ba = lin(ks[4], ks[5], 32, action_dim)
    wc, bc = lin(ks[6], ks[7], 32, 1)
    return {"w1": w1, "b1": b1, "w2": w2, "b2": b2,
            "wa": wa, "ba": ba, "wc": wc, "bc": bc}


if __name__ == "__main__":
    state_dim, action_dim, batch = 4, 2, 8  # CartPole-sized problem

    key = jax.random.PRNGKey(0)
    k_params, k_state = jax.random.split(key)
    params = init_params(k_params, state_dim, action_dim)
    state = jax.random.normal(k_state, (batch, state_dim), jnp.float32)

    probs, value = actor_critic_forward(state, params)
    probs, value = jax.block_until_ready((probs, value))

    # shapes match the PyTorch module
    assert probs.shape == (batch, action_dim)
    assert value.shape == (batch, 1)
    # softmax rows sum to 1 (exact division in-kernel)
    assert bool(jnp.allclose(jnp.sum(probs, axis=-1), 1.0, atol=1e-5))
    # match pure-JAX reference of the PyTorch forward
    ref_probs, ref_value = actor_critic_reference(state, params)
    assert bool(jnp.allclose(probs, ref_probs, atol=1e-5, rtol=1e-5))
    assert bool(jnp.allclose(value, ref_value, atol=1e-5, rtol=1e-5))

    print("KERNEL_OK")
</pallas_src>

<mosaic_0001>
module attributes {stable_mosaic.version = 11 : i64} {
  func.func @actor_critic_kernel(%arg0: i32, %arg1: memref<4x128xf32, #tpu.memory_space<vmem>>, %arg2: memref<64x4xf32, #tpu.memory_space<vmem>>, %arg3: memref<64x1xf32, #tpu.memory_space<vmem>>, %arg4: memref<32x64xf32, #tpu.memory_space<vmem>>, %arg5: memref<32x1xf32, #tpu.memory_space<vmem>>, %arg6: memref<3x32xf32, #tpu.memory_space<vmem>>, %arg7: memref<3x1xf32, #tpu.memory_space<vmem>>, %arg8: memref<3x128xf32, #tpu.memory_space<vmem>>) attributes {dimension_semantics = [#tpu.dimension_semantics<parallel>], iteration_bounds = array<i64: 1>, scalar_prefetch = 0 : i64, scratch_operands = 0 : i64, tpu.core_type = #tpu.core_type<tc>, window_params = [{transform_indices = @transform_0, window_bounds = array<i64: 4, 128>}, {pipeline_mode = #tpu.pipeline_mode<synchronous>, transform_indices = @transform_1, window_bounds = array<i64: 64, 4>}, {pipeline_mode = #tpu.pipeline_mode<synchronous>, transform_indices = @transform_2, window_bounds = array<i64: 64, 1>}, {pipeline_mode = #tpu.pipeline_mode<synchronous>, transform_indices = @transform_3, window_bounds = array<i64: 32, 64>}, {pipeline_mode = #tpu.pipeline_mode<synchronous>, transform_indices = @transform_4, window_bounds = array<i64: 32, 1>}, {pipeline_mode = #tpu.pipeline_mode<synchronous>, transform_indices = @transform_5, window_bounds = array<i64: 3, 32>}, {pipeline_mode = #tpu.pipeline_mode<synchronous>, transform_indices = @transform_6, window_bounds = array<i64: 3, 1>}, {transform_indices = @transform_7, window_bounds = array<i64: 3, 128>}]} {
    %c0 = arith.constant 0 : index
    %c0_0 = arith.constant 0 : index
    %0 = vector.load %arg1[%c0, %c0_0] : memref<4x128xf32, #tpu.memory_space<vmem>>, vector<4x128xf32>
    %c0_1 = arith.constant 0 : index
    %c0_2 = arith.constant 0 : index
    %1 = vector.load %arg2[%c0_1, %c0_2] : memref<64x4xf32, #tpu.memory_space<vmem>>, vector<64x4xf32>
    %cst = arith.constant dense<0.000000e+00> : vector<64x128xf32>
    %2 = tpu.matmul %1, %0, %cst {dimension_numbers = #tpu.dot_dimension_numbers<[1], [0], [0], [1], [0, 0, 1, 1], [], []>} : vector<64x4xf32>, vector<4x128xf32>, vector<64x128xf32> -> vector<64x128xf32>
    %c0_3 = arith.constant 0 : index
    %c0_4 = arith.constant 0 : index
    %3 = vector.load %arg3[%c0_3, %c0_4] : memref<64x1xf32, #tpu.memory_space<vmem>>, vector<64x1xf32>
    %4 = vector.broadcast %3 : vector<64x1xf32> to vector<64x128xf32>
    %5 = arith.addf %2, %4 : vector<64x128xf32>
    %6 = math.tanh %5 : vector<64x128xf32>
    %c0_5 = arith.constant 0 : index
    %c0_6 = arith.constant 0 : index
    %7 = vector.load %arg4[%c0_5, %c0_6] : memref<32x64xf32, #tpu.memory_space<vmem>>, vector<32x64xf32>
    %cst_7 = arith.constant dense<0.000000e+00> : vector<32x128xf32>
    %8 = tpu.matmul %7, %6, %cst_7 {dimension_numbers = #tpu.dot_dimension_numbers<[1], [0], [0], [1], [0, 0, 1, 1], [], []>} : vector<32x64xf32>, vector<64x128xf32>, vector<32x128xf32> -> vector<32x128xf32>
    %c0_8 = arith.constant 0 : index
    %c0_9 = arith.constant 0 : index
    %9 = vector.load %arg5[%c0_8, %c0_9] : memref<32x1xf32, #tpu.memory_space<vmem>>, vector<32x1xf32>
    %10 = vector.broadcast %9 : vector<32x1xf32> to vector<32x128xf32>
    %11 = arith.addf %8, %10 : vector<32x128xf32>
    %12 = math.tanh %11 : vector<32x128xf32>
    %c0_10 = arith.constant 0 : index
    %c0_11 = arith.constant 0 : index
    %13 = vector.load %arg6[%c0_10, %c0_11] : memref<3x32xf32, #tpu.memory_space<vmem>>, vector<3x32xf32>
    %cst_12 = arith.constant dense<0.000000e+00> : vector<3x128xf32>
    %14 = tpu.matmul %13, %12, %cst_12 {dimension_numbers = #tpu.dot_dimension_numbers<[1], [0], [0], [1], [0, 0, 1, 1], [], []>} : vector<3x32xf32>, vector<32x128xf32>, vector<3x128xf32> -> vector<3x128xf32>
    %c0_13 = arith.constant 0 : index
    %c0_14 = arith.constant 0 : index
    %15 = vector.load %arg7[%c0_13, %c0_14] : memref<3x1xf32, #tpu.memory_space<vmem>>, vector<3x1xf32>
    %16 = vector.broadcast %15 : vector<3x1xf32> to vector<3x128xf32>
    %17 = arith.addf %14, %16 : vector<3x128xf32>
    %18 = vector.extract_strided_slice %17 {offsets = [0, 0], sizes = [2, 128], strides = [1, 1]} : vector<3x128xf32> to vector<2x128xf32>
    %19 = vector.extract_strided_slice %17 {offsets = [2, 0], sizes = [1, 128], strides = [1, 1]} : vector<3x128xf32> to vector<1x128xf32>
    %cst_15 = arith.constant dense<0xFF800000> : vector<128xf32>
    %20 = vector.multi_reduction <maximumf>, %18, %cst_15 [0] : vector<2x128xf32> to vector<128xf32>
    %21 = vector.shape_cast %20 : vector<128xf32> to vector<1x128xf32>
    %22 = vector.broadcast %21 : vector<1x128xf32> to vector<2x128xf32>
    %23 = arith.subf %18, %22 : vector<2x128xf32>
    %24 = math.exp %23 : vector<2x128xf32>
    %cst_16 = arith.constant dense<0.000000e+00> : vector<128xf32>
    %25 = vector.multi_reduction <add>, %24, %cst_16 [0] : vector<2x128xf32> to vector<128xf32>
    %26 = vector.shape_cast %25 : vector<128xf32> to vector<1x128xf32>
    %27 = vector.broadcast %26 : vector<1x128xf32> to vector<2x128xf32>
    %28 = arith.divf %24, %27 : vector<2x128xf32>
    %c0_17 = arith.constant 0 : index
    %c0_18 = arith.constant 0 : index
    %29 = vector.load %arg8[%c0_17, %c0_18] : memref<3x128xf32, #tpu.memory_space<vmem>>, vector<2x128xf32>
    tpu.vector_store %arg8[%c0_17, %c0_18], %28 {strides = array<i32>} : memref<3x128xf32, #tpu.memory_space<vmem>>, vector<2x128xf32>,
    %c2 = arith.constant 2 : index
    %c0_19 = arith.constant 0 : index
    %30 = vector.load %arg8[%c2, %c0_19] : memref<3x128xf32, #tpu.memory_space<vmem>>, vector<1x128xf32>
    tpu.vector_store %arg8[%c2, %c0_19], %19 {strides = array<i32>} : memref<3x128xf32, #tpu.memory_space<vmem>>, vector<1x128xf32>,
    return
  }
  func.func @transform_0(%arg0: i32) -> (i32, i32) {
    %c0_i32 = arith.constant 0 : i32
    %c0_i32_0 = arith.constant 0 : i32
    return %c0_i32, %arg0 : i32, i32
  }
  func.func @transform_1(%arg0: i32) -> (i32, i32) {
    %c0_i32 = arith.constant 0 : i32
    %c0_i32_0 = arith.constant 0 : i32
    %c0_i32_1 = arith.constant 0 : i32
    return %c0_i32, %c0_i32_0 : i32, i32
  }
  func.func @transform_2(%arg0: i32) -> (i32, i32) {
    %c0_i32 = arith.constant 0 : i32
    %c0_i32_0 = arith.constant 0 : i32
    %c0_i32_1 = arith.constant 0 : i32
    return %c0_i32, %c0_i32_0 : i32, i32
  }
  func.func @transform_3(%arg0: i32) -> (i32, i32) {
    %c0_i32 = arith.constant 0 : i32
    %c0_i32_0 = arith.constant 0 : i32
    %c0_i32_1 = arith.constant 0 : i32
    return %c0_i32, %c0_i32_0 : i32, i32
  }
  func.func @transform_4(%arg0: i32) -> (i32, i32) {
    %c0_i32 = arith.constant 0 : i32
    %c0_i32_0 = arith.constant 0 : i32
    %c0_i32_1 = arith.constant 0 : i32
    return %c0_i32, %c0_i32_0 : i32, i32
  }
  func.func @transform_5(%arg0: i32) -> (i32, i32) {
    %c0_i32 = arith.constant 0 : i32
    %c0_i32_0 = arith.constant 0 : i32
    %c0_i32_1 = arith.constant 0 : i32
    return %c0_i32, %c0_i32_0 : i32, i32
  }
  func.func @transform_6(%arg0: i32) -> (i32, i32) {
    %c0_i32 = arith.constant 0 : i32
    %c0_i32_0 = arith.constant 0 : i32
    %c0_i32_1 = arith.constant 0 : i32
    return %c0_i32, %c0_i32_0 : i32, i32
  }
  func.func @transform_7(%arg0: i32) -> (i32, i32) {
    %c0_i32 = arith.constant 0 : i32
    %c0_i32_0 = arith.constant 0 : i32
    return %c0_i32, %arg0 : i32, i32
  }
}

</mosaic_0001>

<bundles_post_ra>
// kernel: tpu_custom_call.1
= control target key start
LH: loop header
LB: loop body
LE: loop exit
PB: predicated region body
PF: predicated region fallthrough
CT: control target
= control target key end

     0   :  { %vm109_vm0 = vcmask 1043456   ;;  %vm84_vm1 = vcmask 31744   ;;  %v641_v4 = vmov 0   ;;  %s791_s0 = inlined_call_operand.vmem [shape: f32[4,128], index: 0, kind: input, shape index: {}]   ;;  %s792_s1 = inlined_call_operand.vmem [shape: f32[64,4], index: 1, kind: input, shape index: {}]   ;;  %s793_s2 = inlined_call_operand.vmem [shape: f32[64,1], index: 2, kind: input, shape index: {}]   ;;  %s794_s3 = inlined_call_operand.vmem [shape: f32[32,64], index: 3, kind: input, shape index: {}]   ;;  %s795_s4 = inlined_call_operand.vmem [shape: f32[32,1], index: 4, kind: input, shape index: {}]   ;;  %s796_s5 = inlined_call_operand.vmem [shape: f32[3,32], index: 5, kind: input, shape index: {}]   ;;  %s797_s6 = inlined_call_operand.vmem [shape: f32[3,1], index: 6, kind: input, shape index: {}]   ;;  %s798_s7 = inlined_call_operand.hbm [shape: f32[3,128], index: 7, kind: output, shape index: {}]  }
   0x1   :  { %v27_v0 = vld [vmem:[%s791_s0] sm:$0xf]  ;;  %v29_v2 = vld [vmem:[%s792_s1 + $0x8] sm:$0xff]  ;;  %v30_v3 = vld [vmem:[%s792_s1 + $0x10] sm:$0xff]  ;;  %587 = vset.pattern.permute.xlu0 %v641_v4  ;;  %588 = vset.pattern.permute.xlu1 %v641_v4 }
   0x2   :  { %v28_v1 = vld [vmem:[%s792_s1] sm:$0xff]  ;;  %513 = vmatprep.subr.msk.mxu0 %vm109_vm0, %v27_v0  ;;  %v38_v6 = vld [vmem:[%s793_s2 + $0x10] sm:$0xff]  ;;  %v31_v7 = vld [vmem:[%s792_s1 + $0x18] sm:$0xff] }
   0x3   :  { %515 = vmatprep.mubr.msk.f32.mxu0 %vm84_vm1, %v28_v1  ;;  %514 = vmatpush3.msk.msra.mxu0 %vm109_vm0, %v27_v0  ;;  %v36_v5 = vld [vmem:[%s793_s2] sm:$0xff]  ;;  %v37_v9 = vld [vmem:[%s793_s2 + $0x8] sm:$0xff]  ;;  %v39_v10 = vld [vmem:[%s793_s2 + $0x18] sm:$0xff] }
   0x4   :  { %516 = vmatmul.mubr.msk.f32.vlgmr.msra.gmra.mrb[0].mxu0 %vm84_vm1, %v29_v2  ;;  %46 = vperm.xlu0 %587, %v36_v5   ;;  %v32_v8 = vld [vmem:[%s792_s1 + $0x20] sm:$0xff] }
   0x5   :  { %518 = vmatprep.mubr.msk.f32.mxu0 %vm84_vm1, %v30_v3  ;;  %56 = vperm.xlu1 %588, %v38_v6  }
   0x8   :  { %519 = vmatmul.mubr.msk.f32.gmra.mrb[2].mxu0 %vm84_vm1, %v31_v7 }
   0x9   :  { %12 = vsyncpa [#allocation3], 0  ;;  %521 = vmatprep.mubr.msk.f32.mxu0 %vm84_vm1, %v32_v8  ;;  %v33_v11 = vld [vmem:[%s792_s1 + $0x28] sm:$0xff]  ;;  %51 = vperm.xlu0 %587, %v37_v9   ;;  %v34_v12 = vld [vmem:[%s792_s1 + $0x30] sm:$0xff]  ;;  %vm254_vm2 = vcmask 523264   ;;  %v642_v63 = vmov 0.0|0.0  }
   0xa   :  { %v40_v13 = vld [vmem:[%s793_s2 + $0x20] sm:$0xff]  ;;  %61 = vperm.xlu1 %588, %v39_v10   ;;  %v41_v14 = vld [vmem:[%s793_s2 + $0x28] sm:$0xff]  ;;  %v35_v15 = vld [vmem:[%s792_s1 + $0x38] sm:$0xff]  ;;  %576 = vmatprep.subr.bf16.mxu0 %v642_v63  ;;  %vm643_vm3 = vmmov 0   ;;  %v644_v0 = vmov 0.0   ;;  %vm363_vm4 = vcmask 261120  }
   0xb   :  { %v42_v16 = vld [vmem:[%s793_s2 + $0x30] sm:$0xff]  ;;  %v43_v17 = vld [vmem:[%s793_s2 + $0x38] sm:$0xff]  ;;  %v230_v18 = vld [vmem:[%s795_s4] sm:$0xff]  ;;  %vm437_vm5 = vcmask 1041408  }
   0xc   :  { %522 = vmatmul.mubr.msk.f32.gmra.mrb[4].mxu0 %vm84_vm1, %v33_v11  ;;  %v231_v19 = vld [vmem:[%s795_s4 + $0x8] sm:$0xff]  ;;  %v232_v20 = vld [vmem:[%s795_s4 + $0x10] sm:$0xff]  ;;  %v233_v21 = vld [vmem:[%s795_s4 + $0x18] sm:$0xff] }
   0xd   :  { %524 = vmatprep.mubr.msk.f32.mxu0 %vm84_vm1, %v34_v12  ;;  %66 = vperm.xlu0 %587, %v40_v13   ;;  %v357_v22 = vld [vmem:[%s797_s6] sm:$0x7]  ;;  %v227_v60 = vld [vmem:[%s794_s3 + $0x8] sm:$0xff]  ;;  %v228_v61 = vld [vmem:[%s794_s3 + $0x10] sm:$0xff] }
   0xe   :  { %71 = vperm.xlu1 %588, %v41_v14   ;;  %v226_v23 = vld [vmem:[%s794_s3] sm:$0xff]  ;;  %v229_v62 = vld [vmem:[%s794_s3 + $0x18] sm:$0xff] }
   0xf   :  { %543 = vmatprep.mubr.msk.f32.mxu1 %vm254_vm2, %v226_v23 }
  0x10   :  { %525 = vmatmul.mubr.msk.f32.gmra.mrb[6].mxu0 %vm84_vm1, %v35_v15 }
  0x11   :  { %76 = vperm.xlu0 %587, %v42_v16   ;;  %557 = vmatprep.mubr.msk.f32.mxu0 %vm643_vm3, %v644_v0 }
  0x12   :  { %81 = vperm.xlu1 %588, %v43_v17  }
  0x15   :  { %236 = vperm.xlu0 %587, %v230_v18  }
  0x16   :  { %241 = vperm.xlu1 %588, %v231_v19   ;;  %v356_v19 = vld [vmem:[%s796_s5] sm:$0x7]  ;;  %s645_s5 = smov [#allocation2]  }
  0x17   :  { %s465_s25 = sshll.u32 %s645_s5, 4  ;;  %s466_s25 = int_to_ptr.vmem [resolvable:$true] %s465_s25 }
  0x18   :  { %s617_s26 = scalar_lea.vmem %s466_s25, 64  ;;  %p622_p1 = scmp.lt.s32.totalorder %s466_s25, %s466_s25 }
  0x19   :  { %246 = vperm.xlu0 %587, %v232_v20   ;;  %p618_p0 = scmp.ne.s32.totalorder %s466_s25, %s617_s26  ;;  %p623_p2 = scmp.lt.s32.totalorder %s617_s26, %s617_s26 }
  0x1a   :  { %251 = vperm.xlu1 %588, %v233_v21  }
  0x1b   :  { %p624_p3 = por %p623_p2, %p622_p1 }
  0x1d   :  { %360 = vperm.xlu0 %587, %v357_v22   ;;  %p625_p4 = pnand %p624_p3, %p618_p0 }
  0x83   :  { %v47_v24 = vpop.permute.xlu0 %46 }
  0x84   :  { %v57_v25 = vpop.permute.xlu1 %56 }
  0x88   :  { %v52_v26 = vpop.permute.xlu0 %51 }
  0x89   :  { %v62_v27 = vpop.permute.xlu1 %61 }
  0x8c   :  { %v67_v37 = vpop.permute.xlu0 %66 }
  0x8d   :  { %v72_v35 = vpop.permute.xlu1 %71 }
  0x90   :  { %v77_v45 = vpop.permute.xlu0 %76 }
  0x91   :  { %v82_v42 = vpop.permute.xlu1 %81 }
  0x94   :  { %v237_v2 = vpop.permute.xlu0 %236 }
  0x95   :  { %v242_v1 = vpop.permute.xlu1 %241 }
  0x98   :  { %v247_v9 = vpop.permute.xlu0 %246 }
  0x99   :  { %v252_v7 = vpop.permute.xlu1 %251 }
  0x9c   :  { %v361_v20 = vpop.permute.xlu0 %360 }
  0xd7   :  { %v517_v28 = vpop.f32.mrb[0].mxu0 }
  0xd8   :  { %v185_v29 = vadd.f32 %v517_v28, %v52_v26  ;;  %v179_v30 = vpop.f32.mrb[1].mxu0 }
  0xd9   :  { %v180_v31 = vadd.f32 %v179_v30, %v47_v24 }
  0xda   :  { %589 = vtanh.f32 %v185_v29 }
  0xdb   :  { %591 = vtanh.f32 %v180_v31  ;;  %v520_v32 = vpop.f32.mrb[2].mxu0 }
  0xdc   :  { %v195_v33 = vadd.f32 %v520_v32, %v62_v27  ;;  %v189_v34 = vpop.f32.mrb[3].mxu0 }
  0xdd   :  { %v190_v36 = vadd.f32 %v189_v34, %v57_v25 }
  0xde   :  { %593 = vtanh.f32 %v195_v33 }
  0xdf   :  { %595 = vtanh.f32 %v190_v36  ;;  %v523_v38 = vpop.f32.mrb[4].mxu0 }
  0xe0   :  { %v205_v39 = vadd.f32 %v523_v38, %v72_v35  ;;  %v199_v40 = vpop.f32.mrb[5].mxu0 }
  0xe1   :  { %v200_v41 = vadd.f32 %v199_v40, %v67_v37 }
  0xe2   :  { %597 = vtanh.f32 %v205_v39 }
  0xe3   :  { %599 = vtanh.f32 %v200_v41  ;;  %v526_v43 = vpop.f32.mrb[6].mxu0 }
  0xe4   :  { %v590_v44 = vpop.eup %589  ;;  %v215_v46 = vadd.f32 %v526_v43, %v82_v42  ;;  %v209_v47 = vpop.f32.mrb[7].mxu0 }
  0xe5   :  { %v592_v48 = vpop.eup %591  ;;  %v210_v49 = vadd.f32 %v209_v47, %v77_v45 }
  0xe6   :  { %601 = vtanh.f32 %v215_v46  ;;  %v560_v50 = vpack.c.bf16 %v590_v44, %v592_v48 }
  0xe7   :  { %603 = vtanh.f32 %v210_v49 }
  0xe8   :  { %v594_v51 = vpop.eup %593  ;;  %561 = vmatprep.subr.bf16.mxu1 %v560_v50 }
  0xe9   :  { %v596_v52 = vpop.eup %595  ;;  %563 = vmatpush3.bf16.msra.mxu1 %v560_v50 }
  0xea   :  { %v564_v53 = vpack.c.bf16 %v594_v51, %v596_v52 }
  0xec   :  { %v598_v54 = vpop.eup %597  ;;  %565 = vmatprep.subr.bf16.mxu1 %v564_v53 }
  0xed   :  { %v600_v55 = vpop.eup %599  ;;  %567 = vmatpush3.bf16.msra.mxu1 %v564_v53 }
  0xee   :  { %v568_v56 = vpack.c.bf16 %v598_v54, %v600_v55 }
  0xf0   :  { %v602_v57 = vpop.eup %601  ;;  %569 = vmatprep.subr.bf16.mxu1 %v568_v56 }
  0xf1   :  { %v604_v58 = vpop.eup %603  ;;  %571 = vmatpush3.bf16.msra.mxu1 %v568_v56 }
  0xf2   :  { %v572_v59 = vpack.c.bf16 %v602_v57, %v604_v58 }
  0xf4   :  { %573 = vmatprep.subr.bf16.mxu1 %v572_v59 }
  0xf5   :  { %575 = vmatpush3.bf16.msra.mxu1 %v572_v59 }
  0xf8   :  { %544 = vmatmul.mubr.msk.f32.vlgmr.msra.gmra.mrb[0].mxu1 %vm254_vm2, %v227_v60 }
  0xf9   :  { %546 = vmatprep.mubr.msk.f32.mxu1 %vm254_vm2, %v228_v61 }
  0xfc   :  { %547 = vmatmul.mubr.msk.f32.gmra.mrb[2].mxu1 %vm254_vm2, %v229_v62 }
 0x1cb   :  { %v545_v3 = vpop.f32.mrb[0].mxu1 }
 0x1cc   :  { %v339_v4 = vadd.f32 %v545_v3, %v242_v1  ;;  %v333_v5 = vpop.f32.mrb[1].mxu1 }
 0x1cd   :  { %v334_v6 = vadd.f32 %v333_v5, %v237_v2 }
 0x1ce   :  { %605 = vtanh.f32 %v339_v4 }
 0x1cf   :  { %607 = vtanh.f32 %v334_v6  ;;  %v548_v8 = vpop.f32.mrb[2].mxu1 }
 0x1d0   :  { %v349_v10 = vadd.f32 %v548_v8, %v252_v7  ;;  %v343_v11 = vpop.f32.mrb[3].mxu1 }
 0x1d1   :  { %v344_v12 = vadd.f32 %v343_v11, %v247_v9 }
 0x1d2   :  { %609 = vtanh.f32 %v349_v10 }
 0x1d3   :  { %611 = vtanh.f32 %v344_v12 }
 0x1d8   :  { %v606_v13 = vpop.eup %605 }
 0x1d9   :  { %v608_v14 = vpop.eup %607 }
 0x1da   :  { %v577_v15 = vpack.c.bf16 %v606_v13, %v608_v14 }
 0x1dc   :  { %v610_v16 = vpop.eup %609  ;;  %578 = vmatpush3.bf16.msra.mxu0 %v577_v15 }
 0x1dd   :  { %v612_v17 = vpop.eup %611  ;;  %579 = vmatprep.subr.bf16.mxu0 %v642_v63 }
 0x1de   :  { %v580_v18 = vpack.c.bf16 %v610_v16, %v612_v17 }
 0x1e0   :  { %581 = vmatpush3.bf16.msra.mxu0 %v580_v18 }
 0x1e3   :  { %558 = vmatmul.mubr.msk.f32.vlgmr.msra.gmra.mrb[8].mxu0 %vm363_vm4, %v356_v19 }
 0x2b6   :  { %v433_v21 = vpop.f32.mrb[8].mxu0 }
 0x2b7   :  { %v434_v22 = vadd.f32 %v433_v21, %v361_v20  ;;  %v559_v23 = vpop.f32.mrb[9].mxu0 }
 0x2b9   :  { %v438_v24 = vsel %vm437_vm5, %v434_v22, -inf  ;;  %458 = vst [vmem:[#allocation2] sm:$0x4] %v434_v22 }
 0x2ba   :  { %v439_v25 = vrot.slane %v438_v24, 4 }
 0x2bc   :  { %v440_v26 = vmax.f32 %v438_v24, %v439_v25 }
 0x2be   :  { %v441_v27 = vrot.slane %v440_v26, 2 }
 0x2c0   :  { %v442_v28 = vmax.f32 %v440_v26, %v441_v27 }
 0x2c2   :  { %v443_v29 = vrot.slane %v442_v28, 1 }
 0x2c4   :  { %v444_v30 = vmax.f32 %v442_v28, %v443_v29 }
 0x2c6   :  { %v445_v31 = vsub.f32 %v434_v22, %v444_v30 }
 0x2c8   :  { %v446_v32 = vmul.f32 1.442695, %v445_v31 }
 0x2ca   :  { %613 = vpow2.f32 %v446_v32 }
 0x2d4   :  { %v614_v33 = vpop.eup %613 }
 0x2d5   :  { %v448_v34 = vsel %vm437_vm5, %v614_v33, 0.0 }
 0x2d6   :  { %v449_v35 = vrot.slane %v448_v34, 4 }
 0x2d8   :  { %v450_v36 = vadd.f32 %v449_v35, %v448_v34 }
 0x2da   :  { %v451_v37 = vrot.slane %v450_v36, 2 }
 0x2dc   :  { %v452_v38 = vadd.f32 %v451_v37, %v450_v36 }
 0x2de   :  { %v453_v39 = vrot.slane %v452_v38, 1 }
 0x2e0   :  { %v454_v40 = vadd.f32 %v453_v39, %v452_v38 }
 0x2e2   :  { %615 = vrcp.f32 %v454_v40 }
 0x2ec   :  { %v616_v41 = vpop.eup %615 }
 0x2ed   :  { %v456_v42 = vmul.f32 %v616_v41, %v614_v33 }
 0x2ef   :  { %457 = vst [vmem:[#allocation2] sm:$0x3] %v456_v42 }
 0x2f0   :  { %628 = shalt.err (!%p625_p4)
}
 0x2f1   :  { %s629_s29 = scalar_lea.hbm %s798_s7, 64 }
 0x2f2   :  { %p630_p5 = scmp.ne.s32.totalorder %s798_s7, %s629_s29  ;;  %p633_p6 = scmp.lt.u32.totalorder %s629_s29, %s798_s7 }
 0x2f4   :  { %p635_p7 = pnand %p633_p6, %p630_p5 }
 0x2f6   :  { %638 = shalt.err (!%p635_p7)
}
 0x2f7   :  { %468 = dma.vmem_to_hbm [thread:$0]  %s466_s25, 64, %s798_s7, [#allocation3]  }
 0x2f8   :  { %639 = dma.done.wait [#allocation3], 64  }
 0x2f9   :  { %640 = vsyncadd [#allocation3], 4294967232 }
 0x2fa   :  { %472 = vsyncpa [#allocation3], 1 }

</bundles_post_ra>
